<compile_context>
chip_gen: v7x
topology: tpu7x:2x2x1
jax: 0.10.0
libtpu: 0.0.40
codegen_flags: <defaults>
</compile_context>

<pallas_src>
import functools

import jax
import jax.numpy as jnp
from jax import lax
from jax.experimental import pallas as pl
from jax.experimental.pallas import tpu as pltpu


def _round_up(x: int, m: int) -> int:
    return (x + m - 1) // m * m


def _make_mlp_kernel(*, negative_slope: float, use_activation: bool, use_dropout: bool):
    def kernel(*refs):
        if use_dropout:
            x_ref, w_ref, b_ref, mask_ref, o_ref = refs
        else:
            x_ref, w_ref, b_ref, o_ref = refs
        # MXU: contract x (tm, n_in) with w (n_out, n_in) on the n_in axis.
        y = lax.dot_general(
            x_ref[...], w_ref[...],
            dimension_numbers=(((1,), (1,)), ((), ())),
            preferred_element_type=jnp.float32,
        )
        y = y + b_ref[...]                                   # (1, n_out) broadcast
        if use_activation:
            y = jnp.where(y >= 0, y, jnp.float32(negative_slope) * y)
        if use_dropout:
            y = y * mask_ref[...]                            # mask already carries 1/(1-p)
        o_ref[...] = y.astype(o_ref.dtype)

    return kernel


@functools.partial(
    jax.jit,
    static_argnames=("dropout_p", "training", "negative_slope", "activation", "mxu_bf16"),
)
def mlp_forward(x, weight, bias, seed=0, *, dropout_p=0.33, training=False,
                negative_slope=0.1, activation=True, mxu_bf16=False):
    """Pallas TPU implementation of MLP.forward.

    x:      (..., n_in) float32
    weight: (n_out, n_in) float32   (PyTorch nn.Linear convention, NOT transposed)
    bias:   (n_out,)      float32
    seed:   int32 scalar  (dropout mask seed, used only when training=True)
    """
    n_out, n_in = weight.shape
    lead = x.shape[:-1]
    m = 1
    for d in lead:
        m *= d
    x2d = x.reshape(m, n_in)

    # ---- lane-dense padding / tiling ------------------------------------
    n_in_p = _round_up(n_in, 128)
    n_out_p = _round_up(n_out, 128)
    tm = 256 if m >= 256 else _round_up(max(m, 8), 8)   # 256-row tiles at scale
    m_p = _round_up(m, tm)

    mxu_dtype = jnp.bfloat16 if mxu_bf16 else jnp.float32
    x_p = jnp.pad(x2d.astype(mxu_dtype), ((0, m_p - m), (0, n_in_p - n_in)))
    w_p = jnp.pad(weight.astype(mxu_dtype), ((0, n_out_p - n_out), (0, n_in_p - n_in)))
    b_p = jnp.pad(bias.astype(jnp.float32).reshape(1, n_out), ((0, 0), (0, n_out_p - n_out)))

    use_dropout = bool(training) and dropout_p > 0.0
    args = [x_p, w_p, b_p]
    in_specs = [
        pl.BlockSpec((tm, n_in_p), lambda i: (i, 0)),        # x: streamed per tile
        pl.BlockSpec((n_out_p, n_in_p), lambda i: (0, 0)),   # W: VMEM-resident
        pl.BlockSpec((1, n_out_p), lambda i: (0, 0)),        # b: VMEM-resident
    ]
    if use_dropout:
        scale = 1.0 / (1.0 - dropout_p)
        keep = jax.random.bernoulli(jax.random.PRNGKey(seed), 1.0 - dropout_p, (m, n_out))
        mask = keep.astype(jnp.float32) * jnp.float32(scale)   # inverted dropout
        mask_p = jnp.pad(mask, ((0, m_p - m), (0, n_out_p - n_out)))
        args.append(mask_p)
        in_specs.append(pl.BlockSpec((tm, n_out_p), lambda i: (i, 0)))

    kernel = _make_mlp_kernel(
        negative_slope=negative_slope,
        use_activation=bool(activation),
        use_dropout=use_dropout,
    )

    itemsize = 2 if mxu_bf16 else 4
    bytes_accessed = (
        m_p * n_in_p * itemsize                    # x
        + n_out_p * n_in_p * itemsize              # W
        + n_out_p * 4                              # b
        + m_p * n_out_p * 4                        # out
        + (m_p * n_out_p * 4 if use_dropout else 0)  # mask
    )
    cost = pl.CostEstimate(
        flops=2 * m_p * n_in_p * n_out_p,
        transcendentals=0,
        bytes_accessed=bytes_accessed,
    )

    out2d = pl.pallas_call(
        kernel,
        out_shape=jax.ShapeDtypeStruct((m_p, n_out_p), x.dtype),
        grid=(m_p // tm,),
        in_specs=in_specs,
        out_specs=pl.BlockSpec((tm, n_out_p), lambda i: (i, 0)),
        compiler_params=pltpu.CompilerParams(dimension_semantics=("parallel",)),
        cost_estimate=cost,
    )(*args)

    return out2d[:m, :n_out].reshape(*lead, n_out)


def _orthogonal_init(key, n_out, n_in, dtype=jnp.float32):
    # Deterministic stand-in for nn.init.orthogonal_: QR of a Gaussian matrix.
    rows, cols = n_out, n_in
    transpose = rows < cols
    a_shape = (cols, rows) if transpose else (rows, cols)
    a = jax.random.normal(key, a_shape, dtype=jnp.float32)
    q, r = jnp.linalg.qr(a)
    q = q * jnp.sign(jnp.diagonal(r))[None, :]
    w = q.T if transpose else q
    return w.astype(dtype)


if __name__ == "__main__":
    key = jax.random.PRNGKey(0)
    k_x, k_w = jax.random.split(key)

    batch, seq, n_in, n_out = 2, 8, 32, 64
    x = jax.random.normal(k_x, (batch, seq, n_in), dtype=jnp.float32)
    weight = _orthogonal_init(k_w, n_out, n_in)           # (n_out, n_in)
    bias = jnp.zeros((n_out,), dtype=jnp.float32)         # zeros, as in reset_parameters

    # ---- eval mode (dropout = identity), f32 MXU, tight check ------------
    out = mlp_forward(x, weight, bias, seed=0,
                      dropout_p=0.33, training=False, negative_slope=0.1)
    out = jax.block_until_ready(out)
    ref = x @ weight.T + bias
    ref = jnp.where(ref >= 0, ref, 0.1 * ref)
    assert out.shape == (batch, seq, n_out)
    assert jnp.allclose(out, ref, atol=1e-5, rtol=1e-5), "eval-mode mismatch vs reference"

    # ---- training mode (inverted dropout), deterministic mask from seed --
    seed = 123
    p = 0.33
    out_tr = mlp_forward(x, weight, bias, seed=seed,
                         dropout_p=p, training=True, negative_slope=0.1)
    out_tr = jax.block_until_ready(out_tr)
    keep = jax.random.bernoulli(jax.random.PRNGKey(seed), 1.0 - p,
                                (batch * seq, n_out)).astype(jnp.float32)
    ref_tr = ref.reshape(batch * seq, n_out) * (keep * jnp.float32(1.0 / (1.0 - p)))
    assert out_tr.shape == (batch, seq, n_out)
    assert jnp.allclose(out_tr.reshape(batch * seq, n_out), ref_tr,
                        atol=1e-5, rtol=1e-5), "training-mode mismatch vs reference"

    # ---- bf16 MXU operand fast path (v6e/v7x), relaxed tolerance ----------
    out_bf16 = mlp_forward(x, weight, bias, seed=0,
                           dropout_p=0.33, training=False, mxu_bf16=True)
    out_bf16 = jax.block_until_ready(out_bf16)
    assert out_bf16.shape == (batch, seq, n_out)
    assert jnp.allclose(out_bf16, ref, atol=5e-2, rtol=5e-2), "bf16 path mismatch"

    print("KERNEL_OK")
</pallas_src>

<mosaic_0001>
module attributes {stable_mosaic.version = 11 : i64} {
  func.func @kernel(%arg0: i32, %arg1: memref<16x128xf32, #tpu.memory_space<vmem>>, %arg2: memref<128x128xf32, #tpu.memory_space<vmem>>, %arg3: memref<1x128xf32, #tpu.memory_space<vmem>>, %arg4: memref<16x128xf32, #tpu.memory_space<vmem>>) attributes {dimension_semantics = [#tpu.dimension_semantics<parallel>], iteration_bounds = array<i64: 1>, scalar_prefetch = 0 : i64, scratch_operands = 0 : i64, tpu.core_type = #tpu.core_type<tc>, window_params = [{transform_indices = @transform_0, window_bounds = array<i64: 16, 128>}, {pipeline_mode = #tpu.pipeline_mode<synchronous>, transform_indices = @transform_1, window_bounds = array<i64: 128, 128>}, {pipeline_mode = #tpu.pipeline_mode<synchronous>, transform_indices = @transform_2, window_bounds = array<i64: 1, 128>}, {transform_indices = @transform_3, window_bounds = array<i64: 16, 128>}]} {
    %c0 = arith.constant 0 : index
    %c0_0 = arith.constant 0 : index
    %0 = vector.load %arg1[%c0, %c0_0] : memref<16x128xf32, #tpu.memory_space<vmem>>, vector<16x128xf32>
    %c0_1 = arith.constant 0 : index
    %c0_2 = arith.constant 0 : index
    %1 = vector.load %arg2[%c0_1, %c0_2] : memref<128x128xf32, #tpu.memory_space<vmem>>, vector<128x128xf32>
    %cst = arith.constant dense<0.000000e+00> : vector<16x128xf32>
    %2 = tpu.matmul %0, %1, %cst {dimension_numbers = #tpu.dot_dimension_numbers<[1], [1], [0], [0], [0, 0, 1, 0], [], []>} : vector<16x128xf32>, vector<128x128xf32>, vector<16x128xf32> -> vector<16x128xf32>
    %c0_3 = arith.constant 0 : index
    %c0_4 = arith.constant 0 : index
    %3 = vector.load %arg3[%c0_3, %c0_4] : memref<1x128xf32, #tpu.memory_space<vmem>>, vector<1x128xf32>
    %4 = vector.broadcast %3 : vector<1x128xf32> to vector<16x128xf32>
    %5 = arith.addf %2, %4 : vector<16x128xf32>
    %cst_5 = arith.constant 0.000000e+00 : f32
    %6 = vector.broadcast %cst_5 : f32 to vector<16x128xf32>
    %7 = arith.cmpf oge, %5, %6 : vector<16x128xf32>
    %cst_6 = arith.constant 1.000000e-01 : f32
    %8 = vector.broadcast %cst_6 : f32 to vector<16x128xf32>
    %9 = arith.mulf %8, %5 : vector<16x128xf32>
    %10 = arith.select %7, %5, %9 : vector<16x128xi1>, vector<16x128xf32>
    %c0_7 = arith.constant 0 : index
    %c0_8 = arith.constant 0 : index
    %11 = vector.load %arg4[%c0_7, %c0_8] : memref<16x128xf32, #tpu.memory_space<vmem>>, vector<16x128xf32>
    tpu.vector_store %arg4[%c0_7, %c0_8], %10 {strides = array<i32>} : memref<16x128xf32, #tpu.memory_space<vmem>>, vector<16x128xf32>,
    return
  }
  func.func @transform_0(%arg0: i32) -> (i32, i32) {
    %c0_i32 = arith.constant 0 : i32
    %c0_i32_0 = arith.constant 0 : i32
    return %arg0, %c0_i32 : i32, i32
  }
  func.func @transform_1(%arg0: i32) -> (i32, i32) {
    %c0_i32 = arith.constant 0 : i32
    %c0_i32_0 = arith.constant 0 : i32
    %c0_i32_1 = arith.constant 0 : i32
    return %c0_i32, %c0_i32_0 : i32, i32
  }
  func.func @transform_2(%arg0: i32) -> (i32, i32) {
    %c0_i32 = arith.constant 0 : i32
    %c0_i32_0 = arith.constant 0 : i32
    %c0_i32_1 = arith.constant 0 : i32
    return %c0_i32, %c0_i32_0 : i32, i32
  }
  func.func @transform_3(%arg0: i32) -> (i32, i32) {
    %c0_i32 = arith.constant 0 : i32
    %c0_i32_0 = arith.constant 0 : i32
    return %arg0, %c0_i32 : i32, i32
  }
}

</mosaic_0001>

<bundles_post_ra>
// kernel: mlp_forward.1
= control target key start
LH: loop header
LB: loop body
LE: loop exit
PB: predicated region body
PF: predicated region fallthrough
CT: control target
= control target key end

     0   :  { %s295_s1 = inlined_call_operand.vmem [shape: f32[128,128], index: 1, kind: input, shape index: {}]   ;;  %s296_s0 = inlined_call_operand.vmem [shape: f32[16,128], index: 0, kind: input, shape index: {}]   ;;  %s297_s2 = inlined_call_operand.vmem [shape: f32[1,128], index: 2, kind: input, shape index: {}]   ;;  %s298_s3 = inlined_call_operand.vmem [shape: f32[16,128], index: 3, kind: output, shape index: {}]  }
   0x1   :  { %v16_v0 = vld [vmem:[%s295_s1] sm:$0xff]  ;;  %v17_v1 = vld [vmem:[%s295_s1 + $0x8] sm:$0xff]  ;;  %v18_v2 = vld [vmem:[%s295_s1 + $0x10] sm:$0xff] }
   0x2   :  { %v180_v3 = vpack.c.bf16 %v17_v1, %v16_v0  ;;  %v19_v4 = vld [vmem:[%s295_s1 + $0x18] sm:$0xff]  ;;  %v14_v6 = vld [vmem:[%s296_s0] sm:$0xff]  ;;  %v21_v8 = vld [vmem:[%s295_s1 + $0x28] sm:$0xff] }
   0x3   :  { %v184_v5 = vpack.c.bf16 %v19_v4, %v18_v2  ;;  %v20_v7 = vld [vmem:[%s295_s1 + $0x20] sm:$0xff]  ;;  %177 = vmatprep.mubr.f32.mxu0 %v14_v6  ;;  %v22_v10 = vld [vmem:[%s295_s1 + $0x30] sm:$0xff]  ;;  %v23_v11 = vld [vmem:[%s295_s1 + $0x38] sm:$0xff] }
   0x4   :  { %181 = vmatprep.subr.bf16.mxu0 %v180_v3  ;;  %v188_v9 = vpack.c.bf16 %v21_v8, %v20_v7  ;;  %v192_v12 = vpack.c.bf16 %v23_v11, %v22_v10  ;;  %v24_v13 = vld [vmem:[%s295_s1 + $0x40] sm:$0xff]  ;;  %v25_v14 = vld [vmem:[%s295_s1 + $0x48] sm:$0xff]  ;;  %v26_v16 = vld [vmem:[%s295_s1 + $0x50] sm:$0xff] }
   0x5   :  { %183 = vmatpush3.bf16.xpose.msra.mxu0 %v180_v3  ;;  %v196_v15 = vpack.c.bf16 %v25_v14, %v24_v13  ;;  %v27_v17 = vld [vmem:[%s295_s1 + $0x58] sm:$0xff]  ;;  %v28_v19 = vld [vmem:[%s295_s1 + $0x60] sm:$0xff]  ;;  %v29_v20 = vld [vmem:[%s295_s1 + $0x68] sm:$0xff] }
   0x6   :  { %185 = vmatprep.subr.bf16.mxu0 %v184_v5  ;;  %v200_v18 = vpack.c.bf16 %v27_v17, %v26_v16  ;;  %v204_v21 = vpack.c.bf16 %v29_v20, %v28_v19  ;;  %v30_v22 = vld [vmem:[%s295_s1 + $0x70] sm:$0xff]  ;;  %v31_v23 = vld [vmem:[%s295_s1 + $0x78] sm:$0xff]  ;;  %v15_v25 = vld [vmem:[%s296_s0 + $0x8] sm:$0xff] }
   0x7   :  { %v208_v24 = vpack.c.bf16 %v31_v23, %v30_v22  ;;  %v126_v26 = vld [vmem:[%s297_s2] ss:$0 sm:$0xff] }
   0xd   :  { %187 = vmatpush3.bf16.xpose.msra.mxu0 %v184_v5 }
   0xe   :  { %189 = vmatprep.subr.bf16.mxu0 %v188_v9 }
  0x15   :  { %191 = vmatpush3.bf16.xpose.msra.mxu0 %v188_v9 }
  0x16   :  { %193 = vmatprep.subr.bf16.mxu0 %v192_v12 }
  0x1d   :  { %195 = vmatpush3.bf16.xpose.msra.mxu0 %v192_v12 }
  0x1e   :  { %197 = vmatprep.subr.bf16.mxu0 %v196_v15 }
  0x25   :  { %199 = vmatpush3.bf16.xpose.msra.mxu0 %v196_v15 }
  0x26   :  { %201 = vmatprep.subr.bf16.mxu0 %v200_v18 }
  0x2d   :  { %203 = vmatpush3.bf16.xpose.msra.mxu0 %v200_v18 }
  0x2e   :  { %205 = vmatprep.subr.bf16.mxu0 %v204_v21 }
  0x35   :  { %207 = vmatpush3.bf16.xpose.msra.mxu0 %v204_v21 }
  0x36   :  { %209 = vmatprep.subr.bf16.mxu0 %v208_v24 }
  0x3d   :  { %211 = vmatpush3.bf16.xpose.msra.mxu0 %v208_v24 }
  0x44   :  { %178 = vmatmul.mubr.f32.vlgmr.msra.gmra.mrb[0].mxu0 %v15_v25 }
 0x117   :  { %v179_v27 = vpop.f32.mrb[0].mxu0 }
 0x118   :  { %v111_v28 = vadd.f32 %v179_v27, %v126_v26  ;;  %v105_v29 = vpop.f32.mrb[1].mxu0 }
 0x119   :  { %v106_v30 = vadd.f32 %v126_v26, %v105_v29 }
 0x11a   :  { %vm115_vm0 = vcmp.ge.f32.partialorder %v111_v28, 0.0  ;;  %v117_v31 = vmul.f32 0.1, %v111_v28 }
 0x11b   :  { %vm114_vm1 = vcmp.ge.f32.partialorder %v106_v30, 0.0  ;;  %v116_v32 = vmul.f32 0.1, %v106_v30 }
 0x11c   :  { %v119_v33 = vsel %vm115_vm0, %v111_v28, %v117_v31 }
 0x11d   :  { %121 = vst [vmem:[%s298_s3 + $0x8] sm:$0xff] %v119_v33  ;;  %v118_v34 = vsel %vm114_vm1, %v106_v30, %v116_v32 }
 0x11e   :  { %120 = vst [vmem:[%s298_s3] sm:$0xff] %v118_v34 }

</bundles_post_ra>
